<compile_context>
chip_gen: v7x
topology: tpu7x:2x2x1
jax: 0.10.0
libtpu: 0.0.40
codegen_flags: <defaults>
</compile_context>

<pallas_src>
import functools

import jax
import jax.numpy as jnp
from jax.experimental import pallas as pl
from jax.experimental.pallas import tpu as pltpu


LANE = 128  # vreg lane width; head output is padded to a multiple of this.


def _round_up(x, m):
    return ((x + m - 1) // m) * m


def actor_critic_kernel(
    x_ref,    # (TILE_B, obs)
    w1_ref,   # (obs, H)
    b1_ref,   # (1, H)
    w2_ref,   # (H, H)
    b2_ref,   # (1, H)
    wh_ref,   # (H, OUT_PAD)  = [policy | value | zero-pad]
    bh_ref,   # (1, OUT_PAD)
    out_ref,  # (TILE_B, OUT_PAD)
):
    x = x_ref[...]

    # fc layer 1: Linear + ReLU
    h = jnp.dot(x, w1_ref[...], preferred_element_type=jnp.float32) + b1_ref[...]
    h = jnp.maximum(h, 0.0)

    # fc layer 2: Linear + ReLU
    h = jnp.dot(h, w2_ref[...], preferred_element_type=jnp.float32) + b2_ref[...]
    h = jnp.maximum(h, 0.0)

    # fused policy + value head -> one lane-dense (TILE_B, 128) store
    out = jnp.dot(h, wh_ref[...], preferred_element_type=jnp.float32) + bh_ref[...]
    out_ref[...] = out.astype(out_ref.dtype)


@functools.partial(jax.jit, static_argnames=("tile_b",))
def actor_critic_forward(x, params, *, tile_b=128):
    """x: (B, obs_dim) float32. Returns (logits (B, obs_dim), value (B,))."""
    B, obs_dim = x.shape
    H = params["w1"].shape[1]
    out_pad = params["w_head"].shape[1]

    # Batch tile: multiple of 8 (sublane), capped at tile_b; pad B up to a
    # whole number of tiles (padded rows are sliced off after the call).
    tb = min(_round_up(tile_b, 8), _round_up(B, 8))
    b_padded = _round_up(B, tb)
    if b_padded != B:
        x = jnp.pad(x, ((0, b_padded - B), (0, 0)))

    grid = (b_padded // tb,)

    flops = 2 * b_padded * (obs_dim * H + H * H + H * out_pad)
    bytes_accessed = 4 * (
        b_padded * obs_dim            # x
        + obs_dim * H + H             # w1, b1
        + H * H + H                   # w2, b2
        + H * out_pad + out_pad       # fused head
        + b_padded * out_pad          # output slab
    )

    out = pl.pallas_call(
        actor_critic_kernel,
        out_shape=jax.ShapeDtypeStruct((b_padded, out_pad), jnp.float32),
        grid=grid,
        in_specs=[
            pl.BlockSpec((tb, obs_dim), lambda i: (i, 0)),   # x: tiled over batch
            pl.BlockSpec((obs_dim, H), lambda i: (0, 0)),    # weights resident
            pl.BlockSpec((1, H), lambda i: (0, 0)),
            pl.BlockSpec((H, H), lambda i: (0, 0)),
            pl.BlockSpec((1, H), lambda i: (0, 0)),
            pl.BlockSpec((H, out_pad), lambda i: (0, 0)),
            pl.BlockSpec((1, out_pad), lambda i: (0, 0)),
        ],
        out_specs=pl.BlockSpec((tb, out_pad), lambda i: (i, 0)),
        compiler_params=pltpu.CompilerParams(
            dimension_semantics=("parallel",),
        ),
        cost_estimate=pl.CostEstimate(
            flops=flops, transcendentals=0, bytes_accessed=bytes_accessed
        ),
    )(
        x,
        params["w1"], params["b1"],
        params["w2"], params["b2"],
        params["w_head"], params["b_head"],
    )

    out = out[:B]
    logits = out[:, :obs_dim]
    value = out[:, obs_dim]  # .squeeze(-1) of the value head
    return logits, value


def init_params(key, obs_dim, hidden_size):
    """Deterministic init mimicking nn.Linear's U(-1/sqrt(fan_in), +1/sqrt(fan_in)).

    Policy/value heads are fused into a single zero-padded lane-dense slab
    w_head: (H, OUT_PAD) = [wp | wv | zeros], b_head: (1, OUT_PAD).
    The raw wp/bp/wv/bv are also kept for the pure-JAX reference.
    """
    def linear(key, fan_in, fan_out):
        kw, kb = jax.random.split(key)
        bound = 1.0 / jnp.sqrt(fan_in)
        w = jax.random.uniform(kw, (fan_in, fan_out), jnp.float32, -bound, bound)
        b = jax.random.uniform(kb, (1, fan_out), jnp.float32, -bound, bound)
        return w, b

    k1, k2, k3, k4 = jax.random.split(key, 4)
    w1, b1 = linear(k1, obs_dim, hidden_size)
    w2, b2 = linear(k2, hidden_size, hidden_size)
    wp, bp = linear(k3, hidden_size, obs_dim)
    wv, bv = linear(k4, hidden_size, 1)

    out_pad = _round_up(obs_dim + 1, LANE)
    w_head = jnp.zeros((hidden_size, out_pad), jnp.float32)
    w_head = w_head.at[:, :obs_dim].set(wp)
    w_head = w_head.at[:, obs_dim:obs_dim + 1].set(wv)
    b_head = jnp.zeros((1, out_pad), jnp.float32)
    b_head = b_head.at[:, :obs_dim].set(bp)
    b_head = b_head.at[:, obs_dim:obs_dim + 1].set(bv)

    return {
        "w1": w1, "b1": b1, "w2": w2, "b2": b2,
        "w_head": w_head, "b_head": b_head,
        # kept only for the reference implementation / debugging
        "wp": wp, "bp": bp, "wv": wv, "bv": bv,
    }


def reference_forward(x, params):
    """Pure-JAX reference of the PyTorch module's forward."""
    h = jnp.maximum(x @ params["w1"] + params["b1"], 0.0)
    h = jnp.maximum(h @ params["w2"] + params["b2"], 0.0)
    logits = h @ params["wp"] + params["bp"]
    value = (h @ params["wv"] + params["bv"])[:, 0]
    return logits, value


if __name__ == "__main__":
    obs_dim = 16
    hidden_size = 32
    batch = 8

    key = jax.random.PRNGKey(0)
    kx, kp = jax.random.split(key)
    x = jax.random.normal(kx, (batch, obs_dim), jnp.float32)
    params = init_params(kp, obs_dim, hidden_size)

    logits, value = actor_critic_forward(x, params)
    jax.block_until_ready((logits, value))

    ref_logits, ref_value = reference_forward(x, params)
    assert logits.shape == (batch, obs_dim)
    assert value.shape == (batch,)
    assert jnp.allclose(logits, ref_logits, atol=1e-5, rtol=1e-5)
    assert jnp.allclose(value, ref_value, atol=1e-5, rtol=1e-5)

    # also exercise the batched / gridded path (multiple batch tiles)
    big_b = 300
    xb = jax.random.normal(kx, (big_b, obs_dim), jnp.float32)
    lb, vb = actor_critic_forward(xb, params, tile_b=128)
    jax.block_until_ready((lb, vb))
    rl, rv = reference_forward(xb, params)
    assert lb.shape == (big_b, obs_dim) and vb.shape == (big_b,)
    assert jnp.allclose(lb, rl, atol=1e-5, rtol=1e-5)
    assert jnp.allclose(vb, rv, atol=1e-5, rtol=1e-5)

    print("KERNEL_OK")
</pallas_src>

<mosaic_0001>
module attributes {stable_mosaic.version = 11 : i64} {
  func.func @actor_critic_kernel(%arg0: i32, %arg1: memref<8x16xf32, #tpu.memory_space<vmem>>, %arg2: memref<16x32xf32, #tpu.memory_space<vmem>>, %arg3: memref<1x32xf32, #tpu.memory_space<vmem>>, %arg4: memref<32x32xf32, #tpu.memory_space<vmem>>, %arg5: memref<1x32xf32, #tpu.memory_space<vmem>>, %arg6: memref<32x128xf32, #tpu.memory_space<vmem>>, %arg7: memref<1x128xf32, #tpu.memory_space<vmem>>, %arg8: memref<8x128xf32, #tpu.memory_space<vmem>>) attributes {dimension_semantics = [#tpu.dimension_semantics<parallel>], iteration_bounds = array<i64: 1>, scalar_prefetch = 0 : i64, scratch_operands = 0 : i64, tpu.core_type = #tpu.core_type<tc>, window_params = [{transform_indices = @transform_0, window_bounds = array<i64: 8, 16>}, {pipeline_mode = #tpu.pipeline_mode<synchronous>, transform_indices = @transform_1, window_bounds = array<i64: 16, 32>}, {pipeline_mode = #tpu.pipeline_mode<synchronous>, transform_indices = @transform_2, window_bounds = array<i64: 1, 32>}, {pipeline_mode = #tpu.pipeline_mode<synchronous>, transform_indices = @transform_3, window_bounds = array<i64: 32, 32>}, {pipeline_mode = #tpu.pipeline_mode<synchronous>, transform_indices = @transform_4, window_bounds = array<i64: 1, 32>}, {pipeline_mode = #tpu.pipeline_mode<synchronous>, transform_indices = @transform_5, window_bounds = array<i64: 32, 128>}, {pipeline_mode = #tpu.pipeline_mode<synchronous>, transform_indices = @transform_6, window_bounds = array<i64: 1, 128>}, {transform_indices = @transform_7, window_bounds = array<i64: 8, 128>}]} {
    %c0 = arith.constant 0 : index
    %c0_0 = arith.constant 0 : index
    %0 = vector.load %arg1[%c0, %c0_0] : memref<8x16xf32, #tpu.memory_space<vmem>>, vector<8x16xf32>
    %c0_1 = arith.constant 0 : index
    %c0_2 = arith.constant 0 : index
    %1 = vector.load %arg2[%c0_1, %c0_2] : memref<16x32xf32, #tpu.memory_space<vmem>>, vector<16x32xf32>
    %cst = arith.constant dense<0.000000e+00> : vector<8x32xf32>
    %2 = tpu.matmul %0, %1, %cst {dimension_numbers = #tpu.dot_dimension_numbers<[1], [0], [0], [1], [0, 0, 1, 1], [], []>} : vector<8x16xf32>, vector<16x32xf32>, vector<8x32xf32> -> vector<8x32xf32>
    %c0_3 = arith.constant 0 : index
    %c0_4 = arith.constant 0 : index
    %3 = vector.load %arg3[%c0_3, %c0_4] : memref<1x32xf32, #tpu.memory_space<vmem>>, vector<1x32xf32>
    %4 = vector.broadcast %3 : vector<1x32xf32> to vector<8x32xf32>
    %5 = arith.addf %2, %4 : vector<8x32xf32>
    %cst_5 = arith.constant 0.000000e+00 : f32
    %6 = vector.broadcast %cst_5 : f32 to vector<8x32xf32>
    %7 = arith.maximumf %5, %6 : vector<8x32xf32>
    %c0_6 = arith.constant 0 : index
    %c0_7 = arith.constant 0 : index
    %8 = vector.load %arg4[%c0_6, %c0_7] : memref<32x32xf32, #tpu.memory_space<vmem>>, vector<32x32xf32>
    %cst_8 = arith.constant dense<0.000000e+00> : vector<8x32xf32>
    %9 = tpu.matmul %7, %8, %cst_8 {dimension_numbers = #tpu.dot_dimension_numbers<[1], [0], [0], [1], [0, 0, 1, 1], [], []>} : vector<8x32xf32>, vector<32x32xf32>, vector<8x32xf32> -> vector<8x32xf32>
    %c0_9 = arith.constant 0 : index
    %c0_10 = arith.constant 0 : index
    %10 = vector.load %arg5[%c0_9, %c0_10] : memref<1x32xf32, #tpu.memory_space<vmem>>, vector<1x32xf32>
    %11 = vector.broadcast %10 : vector<1x32xf32> to vector<8x32xf32>
    %12 = arith.addf %9, %11 : vector<8x32xf32>
    %cst_11 = arith.constant 0.000000e+00 : f32
    %13 = vector.broadcast %cst_11 : f32 to vector<8x32xf32>
    %14 = arith.maximumf %12, %13 : vector<8x32xf32>
    %c0_12 = arith.constant 0 : index
    %c0_13 = arith.constant 0 : index
    %15 = vector.load %arg6[%c0_12, %c0_13] : memref<32x128xf32, #tpu.memory_space<vmem>>, vector<32x128xf32>
    %cst_14 = arith.constant dense<0.000000e+00> : vector<8x128xf32>
    %16 = tpu.matmul %14, %15, %cst_14 {dimension_numbers = #tpu.dot_dimension_numbers<[1], [0], [0], [1], [0, 0, 1, 1], [], []>} : vector<8x32xf32>, vector<32x128xf32>, vector<8x128xf32> -> vector<8x128xf32>
    %c0_15 = arith.constant 0 : index
    %c0_16 = arith.constant 0 : index
    %17 = vector.load %arg7[%c0_15, %c0_16] : memref<1x128xf32, #tpu.memory_space<vmem>>, vector<1x128xf32>
    %18 = vector.broadcast %17 : vector<1x128xf32> to vector<8x128xf32>
    %19 = arith.addf %16, %18 : vector<8x128xf32>
    %c0_17 = arith.constant 0 : index
    %c0_18 = arith.constant 0 : index
    %20 = vector.load %arg8[%c0_17, %c0_18] : memref<8x128xf32, #tpu.memory_space<vmem>>, vector<8x128xf32>
    tpu.vector_store %arg8[%c0_17, %c0_18], %19 {strides = array<i32>} : memref<8x128xf32, #tpu.memory_space<vmem>>, vector<8x128xf32>,
    return
  }
  func.func @transform_0(%arg0: i32) -> (i32, i32) {
    %c0_i32 = arith.constant 0 : i32
    %c0_i32_0 = arith.constant 0 : i32
    return %arg0, %c0_i32 : i32, i32
  }
  func.func @transform_1(%arg0: i32) -> (i32, i32) {
    %c0_i32 = arith.constant 0 : i32
    %c0_i32_0 = arith.constant 0 : i32
    %c0_i32_1 = arith.constant 0 : i32
    return %c0_i32, %c0_i32_0 : i32, i32
  }
  func.func @transform_2(%arg0: i32) -> (i32, i32) {
    %c0_i32 = arith.constant 0 : i32
    %c0_i32_0 = arith.constant 0 : i32
    %c0_i32_1 = arith.constant 0 : i32
    return %c0_i32, %c0_i32_0 : i32, i32
  }
  func.func @transform_3(%arg0: i32) -> (i32, i32) {
    %c0_i32 = arith.constant 0 : i32
    %c0_i32_0 = arith.constant 0 : i32
    %c0_i32_1 = arith.constant 0 : i32
    return %c0_i32, %c0_i32_0 : i32, i32
  }
  func.func @transform_4(%arg0: i32) -> (i32, i32) {
    %c0_i32 = arith.constant 0 : i32
    %c0_i32_0 = arith.constant 0 : i32
    %c0_i32_1 = arith.constant 0 : i32
    return %c0_i32, %c0_i32_0 : i32, i32
  }
  func.func @transform_5(%arg0: i32) -> (i32, i32) {
    %c0_i32 = arith.constant 0 : i32
    %c0_i32_0 = arith.constant 0 : i32
    %c0_i32_1 = arith.constant 0 : i32
    return %c0_i32, %c0_i32_0 : i32, i32
  }
  func.func @transform_6(%arg0: i32) -> (i32, i32) {
    %c0_i32 = arith.constant 0 : i32
    %c0_i32_0 = arith.constant 0 : i32
    %c0_i32_1 = arith.constant 0 : i32
    return %c0_i32, %c0_i32_0 : i32, i32
  }
  func.func @transform_7(%arg0: i32) -> (i32, i32) {
    %c0_i32 = arith.constant 0 : i32
    %c0_i32_0 = arith.constant 0 : i32
    return %arg0, %c0_i32 : i32, i32
  }
}

</mosaic_0001>

<bundles_post_ra>
// kernel: actor_critic_forward.1
= control target key start
LH: loop header
LB: loop body
LE: loop exit
PB: predicated region body
PF: predicated region fallthrough
CT: control target
= control target key end

     0   :  { %12 = vsyncpa [#allocation3], 0  ;;  %s629_s0 = inlined_call_operand.hbm [shape: f32[8,16], index: 0, kind: input, shape index: {}]   ;;  %s630_s1 = inlined_call_operand.hbm [shape: f32[16,32], index: 1, kind: input, shape index: {}]   ;;  %s631_s2 = inlined_call_operand.vmem [shape: f32[1,32], index: 2, kind: input, shape index: {}]   ;;  %s632_s3 = inlined_call_operand.hbm [shape: f32[32,32], index: 3, kind: input, shape index: {}]   ;;  %s633_s4 = inlined_call_operand.vmem [shape: f32[1,32], index: 4, kind: input, shape index: {}]   ;;  %s634_s5 = inlined_call_operand.hbm [shape: f32[32,128], index: 5, kind: input, shape index: {}]   ;;  %s635_s6 = inlined_call_operand.vmem [shape: f32[1,128], index: 6, kind: input, shape index: {}]   ;;  %s636_s7 = inlined_call_operand.vmem [shape: f32[8,128], index: 7, kind: output, shape index: {}]  }
   0x1   :  { %13 = vsyncpa [#allocation5], 0 }
   0x2   :  { %14 = vsyncpa [#allocation8], 0  ;;  %s508_s24 = smov [#allocation4]   ;;  %s414_s28 = scalar_lea.hbm %s630_s1, 256 }
   0x3   :  { %s30_s25 = sshll.u32 %s508_s24, 4  ;;  %p415_p0 = scmp.ne.s32.totalorder %s630_s1, %s414_s28  ;;  %s31_s25 = int_to_ptr.vmem [resolvable:$true] %s30_s25 }
   0x4   :  { %p418_p1 = scmp.lt.u32.totalorder %s414_s28, %s630_s1 }
   0x6   :  { %p420_p2 = pnand %p418_p1, %p415_p0 }
   0x8   :  { %423 = shalt.err (!%p420_p2)
}
   0x9   :  { %s424_s10 = scalar_lea.vmem %s31_s25, 256  ;;  %p429_p4 = scmp.lt.s32.totalorder %s31_s25, %s31_s25 }
   0xa   :  { %p425_p3 = scmp.ne.s32.totalorder %s31_s25, %s424_s10  ;;  %p430_p5 = scmp.lt.s32.totalorder %s424_s10, %s424_s10 }
   0xc   :  { %p431_p6 = por %p430_p5, %p429_p4 }
   0xe   :  { %p432_p7 = pnand %p431_p6, %p425_p3 }
  0x10   :  { %435 = shalt.err (!%p432_p7)
}
  0x11   :  { %s509_s11 = smov 128   ;;  %s510_s12 = smov 8  }
  0x12   :  { %36 = dma.hbm_to_vmem [thread:$0]  %s630_s1, 256, %s31_s25, [#allocation5], %s509_s11, %s509_s11, %s510_s12  }
  0x13   :  { %s511_s15 = smov [#allocation2]   ;;  %s512_s17 = smov [#allocation6]  }
  0x14   :  { %s21_s16 = sshll.u32 %s511_s15, 4  ;;  %s44_s18 = sshll.u32 %s512_s17, 4  ;;  %s22_s16 = int_to_ptr.vmem [resolvable:$true] %s21_s16  ;;  %s45_s18 = int_to_ptr.vmem [resolvable:$true] %s44_s18 }
  0x15   :  { %s436_s21 = scalar_lea.hbm %s629_s0, 128 }
  0x16   :  { %p437_p8 = scmp.ne.s32.totalorder %s629_s0, %s436_s21  ;;  %p440_p9 = scmp.lt.u32.totalorder %s436_s21, %s629_s0 }
  0x18   :  { %p442_p10 = pnand %p440_p9, %p437_p8 }
  0x1a   :  { %445 = shalt.err (!%p442_p10)
}
  0x1b   :  { %s446_s1 = scalar_lea.vmem %s22_s16, 128  ;;  %p451_p12 = scmp.lt.s32.totalorder %s22_s16, %s22_s16 }
  0x1c   :  { %p447_p11 = scmp.ne.s32.totalorder %s22_s16, %s446_s1  ;;  %p452_p13 = scmp.lt.s32.totalorder %s446_s1, %s446_s1 }
  0x1e   :  { %p453_p0 = por %p452_p13, %p451_p12 }
  0x20   :  { %p454_p1 = pnand %p453_p0, %p447_p11 }
  0x22   :  { %457 = shalt.err (!%p454_p1)
}
  0x23   :  { %24 = dma.hbm_to_vmem [thread:$0]  %s629_s0, 128, %s22_s16, [#allocation3]  }
  0x24   :  { %s458_s30 = scalar_lea.hbm %s632_s3, 512 }
  0x25   :  { %p459_p2 = scmp.ne.s32.totalorder %s632_s3, %s458_s30  ;;  %p462_p3 = scmp.lt.u32.totalorder %s458_s30, %s632_s3 }
  0x27   :  { %p464_p4 = pnand %p462_p3, %p459_p2 }
  0x29   :  { %467 = shalt.err (!%p464_p4)
}
  0x2a   :  { %s468_s14 = scalar_lea.vmem %s45_s18, 512  ;;  %p473_p6 = scmp.lt.s32.totalorder %s45_s18, %s45_s18 }
  0x2b   :  { %p469_p5 = scmp.ne.s32.totalorder %s45_s18, %s468_s14  ;;  %p474_p7 = scmp.lt.s32.totalorder %s468_s14, %s468_s14 }
  0x2d   :  { %p475_p8 = por %p474_p7, %p473_p6 }
  0x2f   :  { %p476_p9 = pnand %p475_p8, %p469_p5 }
  0x31   :  { %479 = shalt.err (!%p476_p9)
}
  0x32   :  { %50 = dma.hbm_to_vmem [thread:$0]  %s632_s3, 512, %s45_s18, [#allocation5], %s509_s11, %s509_s11, %s510_s12  }
  0x33   :  { %s513_s16 = smov [#allocation7]   ;;  %s480_s21 = scalar_lea.hbm %s634_s5, 512 }
  0x34   :  { %s58_s17 = sshll.u32 %s513_s16, 4  ;;  %p481_p10 = scmp.ne.s32.totalorder %s634_s5, %s480_s21  ;;  %s59_s17 = int_to_ptr.vmem [resolvable:$true] %s58_s17 }
  0x35   :  { %p484_p11 = scmp.lt.u32.totalorder %s480_s21, %s634_s5 }
  0x37   :  { %p486_p12 = pnand %p484_p11, %p481_p10 }
  0x39   :  { %489 = shalt.err (!%p486_p12)
}
  0x3a   :  { %s490_s1 = scalar_lea.vmem %s59_s17, 512  ;;  %p495_p0 = scmp.lt.s32.totalorder %s59_s17, %s59_s17 }
  0x3b   :  { %p491_p13 = scmp.ne.s32.totalorder %s59_s17, %s490_s1  ;;  %p496_p1 = scmp.lt.s32.totalorder %s490_s1, %s490_s1 }
  0x3d   :  { %p497_p2 = por %p496_p1, %p495_p0 }
  0x3f   :  { %p498_p3 = pnand %p497_p2, %p491_p13 }
  0x41   :  { %501 = shalt.err (!%p498_p3)
}
  0x42   :  { %64 = dma.hbm_to_vmem [thread:$0]  %s634_s5, 512, %s59_s17, [#allocation8], %s509_s11, %s509_s11, %s510_s12  }
  0x43   :  { %502 = dma.done.wait [#allocation3], 128  }
  0x44   :  { %503 = vsyncadd [#allocation3], 4294967168 }
  0x45   :  { %504 = dma.done.wait [#allocation5], 768  }
  0x46   :  { %505 = vsyncadd [#allocation5], 4294966528 }
  0x47   :  { %506 = dma.done.wait [#allocation8], 512  }
  0x48   :  { %507 = vsyncadd [#allocation8], 4294966784  ;;  %v514_v0 = vmov 0.0|0.0   ;;  %vm515_vm0 = vmmov 0   ;;  %v516_v1 = vmov 0.0   ;;  %v80_v2 = vld [vmem:[#allocation4] sm:$0xff] }
  0x49   :  { %390 = vmatprep.subr.bf16.mxu0 %v514_v0  ;;  %365 = vmatprep.mubr.msk.f32.mxu0 %vm515_vm0, %v516_v1  ;;  %v81_v3 = vld [vmem:[#allocation4 + $0x8] sm:$0xff]  ;;  %v164_v5 = vld [vmem:[#allocation6] sm:$0xff]  ;;  %v165_v6 = vld [vmem:[#allocation6 + $0x8] sm:$0xff]  ;;  %vm89_vm1 = vcmask 130048   ;;  %vm175_vm2 = vcmask 261120  }
  0x4a   :  { %393 = vmatprep.subr.bf16.mxu1 %v514_v0  ;;  %376 = vmatprep.mubr.msk.f32.mxu1 %vm515_vm0, %v516_v1  ;;  %v391_v4 = vpack.c.bf16 %v81_v3, %v80_v2  ;;  %v394_v7 = vpack.c.bf16 %v165_v6, %v164_v5  ;;  %v79_v8 = vld [vmem:[#allocation2] sm:$0xff]  ;;  %v166_v9 = vld [vmem:[#allocation6 + $0x10] sm:$0xff]  ;;  %v167_v10 = vld [vmem:[#allocation6 + $0x18] sm:$0xff] }
  0x4b   :  { %v397_v11 = vpack.c.bf16 %v167_v10, %v166_v9  ;;  %v250_v12 = vld [vmem:[#allocation7] sm:$0xff]  ;;  %v251_v13 = vld [vmem:[#allocation7 + $0x8] sm:$0xff]  ;;  %v252_v20 = vld [vmem:[#allocation7 + $0x10] sm:$0xff] }
  0x4c   :  { %392 = vmatpush3.bf16.msra.mxu0 %v391_v4  ;;  %395 = vmatpush3.bf16.msra.mxu1 %v394_v7  ;;  %v400_v14 = vpack.c.bf16 %v251_v13, %v250_v12  ;;  %v342_v15 = vld [vmem:[%s631_s2] ss:$0 sm:$0xff]  ;;  %v253_v21 = vld [vmem:[#allocation7 + $0x18] sm:$0xff] }
  0x4d   :  { %399 = vmatprep.subr.bf16.mxu0 %v514_v0  ;;  %396 = vmatprep.subr.bf16.mxu1 %v514_v0  ;;  %v403_v22 = vpack.c.bf16 %v253_v21, %v252_v20  ;;  %v344_v23 = vld [vmem:[%s633_s4] ss:$0 sm:$0xff] }
  0x4e   :  { %v346_v28 = vld [vmem:[%s635_s6] ss:$0 sm:$0xff] }
  0x4f   :  { %366 = vmatmul.mubr.msk.f32.vlgmr.msra.gmra.mrb[0].mxu0 %vm89_vm1, %v79_v8 }
  0x50   :  { %387 = vmatprep.mubr.msk.f32.mxu0 %vm515_vm0, %v516_v1  ;;  %398 = vmatpush3.bf16.msra.mxu1 %v397_v11 }
  0x51   :  { %401 = vmatpush3.bf16.msra.mxu0 %v400_v14 }
  0x52   :  { %402 = vmatprep.subr.bf16.mxu0 %v514_v0 }
  0x55   :  { %404 = vmatpush3.bf16.msra.mxu0 %v403_v22 }
 0x122   :  { %v159_v16 = vpop.f32.mrb[0].mxu0 }
 0x123   :  { %v160_v17 = vadd.f32 %v342_v15, %v159_v16  ;;  %v367_v18 = vpop.f32.mrb[1].mxu0 }
 0x125   :  { %v163_v19 = vmax.f32 %v160_v17, 0.0 }
 0x127   :  { %377 = vmatmul.mubr.msk.f32.vlgmr.msra.gmra.mrb[0].mxu1 %vm175_vm2, %v163_v19 }
 0x1fa   :  { %v245_v24 = vpop.f32.mrb[0].mxu1 }
 0x1fb   :  { %v246_v25 = vadd.f32 %v344_v23, %v245_v24  ;;  %v378_v26 = vpop.f32.mrb[1].mxu1 }
 0x1fd   :  { %v249_v27 = vmax.f32 %v246_v25, 0.0 }
 0x1ff   :  { %388 = vmatmul.mubr.msk.f32.vlgmr.msra.gmra.mrb[2].mxu0 %vm175_vm2, %v249_v27 }
 0x2d2   :  { %v330_v29 = vpop.f32.mrb[2].mxu0 }
 0x2d3   :  { %v331_v30 = vadd.f32 %v346_v28, %v330_v29  ;;  %v389_v31 = vpop.f32.mrb[3].mxu0 }
 0x2d5   :  { %334 = vst [vmem:[%s636_s7] sm:$0xff] %v331_v30 }
 0x2d6   :  { %339 = vsyncpa [#allocation3], 1 }
 0x2d7   :  { %340 = vsyncpa [#allocation5], 1 }
 0x2d8   :  { %341 = vsyncpa [#allocation8], 1 }

</bundles_post_ra>
